<compile_context>
chip_gen: v6e
topology: v6e:2x2x1
jax: 0.10.0
libtpu: 0.0.40
codegen_flags: <defaults>
</compile_context>

<pallas_src>
import jax
import jax.numpy as jnp
import numpy as np
from jax import lax
from jax.experimental import pallas as pl
from jax.experimental.pallas import tpu as pltpu


# ------------------------------------------------------------------ Pallas kernels

def down_kernel(p_ref, w_ref, o_ref):
    """Down-conv GEMM with the up-path ReLU + bf16 cast fused into the epilogue.

    p_ref: (16*cin, tile) bf16 transposed im2col patches of LeakyReLU(x) (columns = positions)
    w_ref: (inner_nc, 16*cin) bf16
    o_ref: (inner_nc, tile) bf16  -- h = relu(conv(lrelu(x))), lane-dense store
    """
    p = p_ref[...].astype(jnp.float32)
    w = w_ref[...].astype(jnp.float32)
    y = jnp.dot(w, p, preferred_element_type=jnp.float32)
    o_ref[...] = jnp.maximum(y, 0.0).astype(o_ref.dtype)   # relu(0)=0 keeps padded cols exact


def up_gemm_stats_kernel(p_ref, w_ref, y_ref, stats_ref):
    """Phase-stacked ConvTranspose GEMM + per-tile BatchNorm partial stats.

    p_ref:     (9*inner_nc, tile) bf16 transposed 3x3-tap patches of h (ReLU already applied)
    w_ref:     (4*outer_nc, 9*inner_nc) bf16 phase-stacked transposed-conv weights
    y_ref:     (4*outer_nc, tile) f32 raw (pre-BN) phase-stacked output, lane-dense store
    stats_ref: (4*outer_nc, 2) f32 per-row [sum, sum_sq] partials, single store per tile
    """
    p = p_ref[...].astype(jnp.float32)
    w = w_ref[...].astype(jnp.float32)
    y = jnp.dot(w, p, preferred_element_type=jnp.float32)
    y_ref[...] = y
    stats_ref[...] = jnp.concatenate(
        [jnp.sum(y, axis=1, keepdims=True), jnp.sum(y * y, axis=1, keepdims=True)], axis=1)


# ------------------------------------------------------------------ wrapper-side glue

def _round_up(v, m):
    return (v + m - 1) // m * m


def _col_tiling(r, max_tile=2048):
    """Lane-dense column tile (multiple of 128) + padded column count.

    The tile is capped at ceil(r/2) (rounded up to 128) so the grid has >=2 steps whenever
    possible, letting dimension_semantics=("parallel",) shard across v7x's two TensorCores.
    """
    half = _round_up(-(-r // 2), 128)
    tile = max(128, min(max_tile, half))
    return tile, _round_up(r, tile)


def _vmem_limit(block_bytes, headroom=4 << 20):
    """Scoped-VMEM budget: double-buffered pipeline per operand + compiler headroom."""
    return int(2 * block_bytes) + headroom


def _build_down_patches(xp, cin, n, oh, ow):
    """Transposed im2col for Conv2d(k=4, s=2, p=1): (16*cin, N*OH*OW), (kh,kw,ci) row order."""
    # TODO(synk): im2col still materializes in HBM (wrapper side); an in-kernel tap formation
    #             needs lane-merging reshapes that are risky to lower, so it is left to XLA.
    taps = []
    for kh in range(4):
        for kw in range(4):
            t = lax.slice(xp, (0, 0, kh, kw),
                          (cin, n, kh + 2 * oh - 1, kw + 2 * ow - 1), (1, 1, 2, 2))
            taps.append(t.reshape(cin, n * oh * ow))
    return jnp.concatenate(taps, axis=0)


def _build_up_patches(hp, inner_nc, n, oh, ow):
    """3x3-tap transposed patches of (padded, ReLU'd) h: (9*inner_nc, N*OH*OW)."""
    taps = []
    for dh in (-1, 0, 1):
        for dw in (-1, 0, 1):
            t = lax.slice(hp, (0, 0, 1 + dh, 1 + dw),
                          (inner_nc, n, 1 + dh + oh, 1 + dw + ow))
            taps.append(t.reshape(inner_nc, n * oh * ow))
    return jnp.concatenate(taps, axis=0)


def _phase_stacked_up_weights(w_up_t, outer_nc, inner_nc):
    """ConvTranspose2d(k=4,s=2,p=1) as 4 output phases over a 3x3 tap window of h.

    Output row y=2a+py gets contributions h[a+d] * W[kh] with kh = py + 1 - 2d (same for x/kw).
    Rows of the result: phase*outer_nc + o ; columns: tap*inner_nc + ci, tap=(d+1)*3+(e+1).
    """
    pairs = {0: ((0, 1), (-1, 3)),      # parity 0: (d, k) with k = 1 - 2d
             1: ((0, 2), (1, 0))}       # parity 1: k = 2 - 2d
    w = jnp.zeros((4 * outer_nc, 9 * inner_nc), jnp.float32)
    for py in (0, 1):
        for px in (0, 1):
            ph = py * 2 + px
            for d, kh in pairs[py]:
                for e, kw in pairs[px]:
                    tap = (d + 1) * 3 + (e + 1)
                    blk = w_up_t[:, :, kh, kw].T                # (outer_nc, inner_nc)
                    w = w.at[ph * outer_nc:(ph + 1) * outer_nc,
                             tap * inner_nc:(tap + 1) * inner_nc].set(blk)
    return w


def unet_innermost_forward(x_nchw, w_down, w_up_t, gamma, beta, mask=None):
    """Pallas implementation of UnetSkipConnectionBlock(innermost=True).forward."""
    x = x_nchw.astype(jnp.float32)
    n, cin, h, w = x.shape
    inner_nc = w_down.shape[0]
    outer_nc = w_up_t.shape[1]
    oh, ow = h // 2, w // 2
    r = n * oh * ow                                   # positions -> lane axis of every kernel
    tile, r_pad = _col_tiling(r)
    grid = (r_pad // tile,)

    # ---------------- down path: LeakyReLU -> Conv2d(k=4, s=2, p=1, bias=False) -> (up) ReLU
    # LeakyReLU applied once in the wrapper (fuses into the tap slicing); lrelu(0)=0 so the
    # spatial zero-padding stays exact.
    x_lr = jnp.where(x >= 0, x, 0.2 * x)
    xc = jnp.transpose(x_lr, (1, 0, 2, 3))            # (cin, N, H, W)
    xp = jnp.pad(xc, ((0, 0), (0, 0), (1, 1), (1, 1)))
    pd = _build_down_patches(xp, cin, n, oh, ow)      # (16*cin, R)
    pd = jnp.pad(pd, ((0, 0), (0, r_pad - r))).astype(jnp.bfloat16)
    wd = jnp.transpose(w_down, (2, 3, 1, 0)).reshape(16 * cin, inner_nc).T   # (inner_nc, 16*cin)
    wd = wd.astype(jnp.bfloat16)

    down_blocks = (16 * cin * tile * 2 + inner_nc * 16 * cin * 2 + inner_nc * tile * 2)
    hT = pl.pallas_call(
        down_kernel,
        out_shape=jax.ShapeDtypeStruct((inner_nc, r_pad), jnp.bfloat16),
        grid=grid,
        in_specs=[pl.BlockSpec((16 * cin, tile), lambda j: (0, j)),
                  pl.BlockSpec((inner_nc, 16 * cin), lambda j: (0, 0))],
        out_specs=pl.BlockSpec((inner_nc, tile), lambda j: (0, j)),
        compiler_params=pltpu.CompilerParams(
            dimension_semantics=("parallel",),
            vmem_limit_bytes=_vmem_limit(down_blocks)),
    )(pd, wd)[:, :r]

    # ---------------- up path: ConvTranspose2d(k=4, s=2, p=1) -> BatchNorm2d
    # TODO(synk): the 9x tap materialization of h still round-trips HBM; forming taps from a
    #             halo'd VMEM block of h would remove it but needs lane-merging in-kernel.
    hc = hT.reshape(inner_nc, n, oh, ow)
    hp = jnp.pad(hc, ((0, 0), (0, 0), (1, 1), (1, 1)))
    pu = _build_up_patches(hp, inner_nc, n, oh, ow)   # (9*inner_nc, R), already bf16 + ReLU'd
    pu = jnp.pad(pu, ((0, 0), (0, r_pad - r)))
    wu = _phase_stacked_up_weights(w_up_t, outer_nc, inner_nc).astype(jnp.bfloat16)

    up_blocks = (9 * inner_nc * tile * 2 + 4 * outer_nc * 9 * inner_nc * 2
                 + 4 * outer_nc * tile * 4 + 4 * outer_nc * 2 * 4)
    y_raw, pstats = pl.pallas_call(
        up_gemm_stats_kernel,
        out_shape=(jax.ShapeDtypeStruct((4 * outer_nc, r_pad), jnp.float32),
                   jax.ShapeDtypeStruct((grid[0], 4 * outer_nc, 2), jnp.float32)),
        grid=grid,
        in_specs=[pl.BlockSpec((9 * inner_nc, tile), lambda j: (0, j)),
                  pl.BlockSpec((4 * outer_nc, 9 * inner_nc), lambda j: (0, 0))],
        out_specs=(pl.BlockSpec((4 * outer_nc, tile), lambda j: (0, j)),
                   pl.BlockSpec((None, 4 * outer_nc, 2), lambda j: (j, 0, 0))),
        compiler_params=pltpu.CompilerParams(
            dimension_semantics=("parallel",),
            vmem_limit_bytes=_vmem_limit(up_blocks)),
    )(pu, wu)

    # Fold partial stats into per-row BN scale/shift (tiny O(outer_nc) work left to XLA).
    # Padded columns contribute exact zeros to both sums; divide by the true element count.
    # TODO(synk): variance uses E[y^2]-E[y]^2 in f32 partial sums; fine at these sizes but a
    #             shifted/Welford accumulation would be needed for very large N*H*W.
    stats = jnp.sum(pstats, axis=0)                               # (4*outer_nc, 2)
    cnt = 4.0 * r                                                 # N*H*W elements per channel
    mean = jnp.sum(stats[:, 0].reshape(4, outer_nc), axis=0) / cnt
    ex2 = jnp.sum(stats[:, 1].reshape(4, outer_nc), axis=0) / cnt
    var = ex2 - mean * mean                                       # biased var (training-mode BN)
    scale_c = gamma.astype(jnp.float32) * lax.rsqrt(var + 1e-5)
    shift_c = beta.astype(jnp.float32) - mean * scale_c
    scale_r = jnp.tile(scale_c, 4).reshape(4 * outer_nc, 1)       # row = phase*outer_nc + o
    shift_r = jnp.tile(shift_c, 4).reshape(4 * outer_nc, 1)

    # BN affine + de-phase (depth->space) + skip concat: pure layout/elementwise work, fused by
    # XLA in a single pass over y_raw (the skip tensor never round-trips through a kernel).
    y_bn = y_raw[:, :r] * scale_r + shift_r
    yph = y_bn.reshape(2, 2, outer_nc, n, oh, ow)                 # [py, px, o, n, a, b]
    y_nchw = jnp.transpose(yph, (3, 2, 4, 0, 5, 1)).reshape(n, outer_nc, h, w)
    out = jnp.concatenate([x, y_nchw], axis=1)                    # torch.cat([x, up(...)], dim=1)
    return out, mask


# ------------------------------------------------------------------ pure-JAX reference

def reference_forward(x_nchw, w_down, w_up_t, gamma, beta):
    xr = jnp.where(x_nchw >= 0, x_nchw, 0.2 * x_nchw)
    hd = lax.conv_general_dilated(
        xr, w_down, window_strides=(2, 2), padding=((1, 1), (1, 1)),
        dimension_numbers=("NCHW", "OIHW", "NCHW"), precision=lax.Precision.HIGHEST)
    hr = jnp.maximum(hd, 0.0)
    w_conv = jnp.transpose(w_up_t[:, :, ::-1, ::-1], (1, 0, 2, 3))   # equivalent OIHW conv kernel
    y = lax.conv_general_dilated(
        hr, w_conv, window_strides=(1, 1), padding=((2, 2), (2, 2)),
        lhs_dilation=(2, 2), dimension_numbers=("NCHW", "OIHW", "NCHW"),
        precision=lax.Precision.HIGHEST)
    mean = jnp.mean(y, axis=(0, 2, 3), keepdims=True)
    var = jnp.mean((y - mean) ** 2, axis=(0, 2, 3), keepdims=True)
    yn = (y - mean) * lax.rsqrt(var + 1e-5)
    yn = yn * gamma.reshape(1, -1, 1, 1) + beta.reshape(1, -1, 1, 1)
    return jnp.concatenate([x_nchw, yn], axis=1)


# ------------------------------------------------------------------ main

if __name__ == "__main__":
    # Module hyper-params (innermost block): input_nc = outer_nc
    outer_nc, inner_nc = 4, 8
    N, H, W = 2, 16, 16

    key = jax.random.PRNGKey(0)
    k_x, k_wd, k_wt, k_g, k_b = jax.random.split(key, 5)

    x = jax.random.normal(k_x, (N, outer_nc, H, W), dtype=jnp.float32)                 # NCHW input
    w_down = jax.random.normal(k_wd, (inner_nc, outer_nc, 4, 4), jnp.float32) * 0.1    # Conv2d (O,I,kH,kW)
    w_up_t = jax.random.normal(k_wt, (inner_nc, outer_nc, 4, 4), jnp.float32) * 0.1    # ConvT (I,O,kH,kW)
    gamma = 1.0 + 0.1 * jax.random.normal(k_g, (outer_nc,), jnp.float32)               # BN weight
    beta = 0.1 * jax.random.normal(k_b, (outer_nc,), jnp.float32)                      # BN bias
    # TODO(synk): BatchNorm running_mean/running_var buffer updates (training-time side effect)
    #             are not modeled; only the forward output (batch statistics) is reproduced.

    fwd = jax.jit(unet_innermost_forward)
    out, mask = fwd(x, w_down, w_up_t, gamma, beta)
    out = jax.block_until_ready(out)

    ref = jax.block_until_ready(reference_forward(x, w_down, w_up_t, gamma, beta))
    assert out.shape == (N, 2 * outer_nc, H, W), out.shape
    assert mask is None
    # Tolerance sized for bf16 HBM operands (f32 accumulation) amplified by BN's 1/sigma scaling.
    np.testing.assert_allclose(np.asarray(out), np.asarray(ref), rtol=5e-2, atol=6e-2)

    print("KERNEL_OK")
</pallas_src>

<mosaic_0001>
module attributes {stable_mosaic.version = 11 : i64} {
  func.func @down_kernel(%arg0: i32, %arg1: memref<64x128xbf16, #tpu.memory_space<vmem>>, %arg2: memref<8x64xbf16, #tpu.memory_space<vmem>>, %arg3: memref<8x128xbf16, #tpu.memory_space<vmem>>) attributes {dimension_semantics = [#tpu.dimension_semantics<parallel>], iteration_bounds = array<i64: 1>, scalar_prefetch = 0 : i64, scratch_operands = 0 : i64, tpu.core_type = #tpu.core_type<tc>, window_params = [{transform_indices = @transform_0, window_bounds = array<i64: 64, 128>}, {pipeline_mode = #tpu.pipeline_mode<synchronous>, transform_indices = @transform_1, window_bounds = array<i64: 8, 64>}, {transform_indices = @transform_2, window_bounds = array<i64: 8, 128>}]} {
    %c0 = arith.constant 0 : index
    %c0_0 = arith.constant 0 : index
    %0 = vector.load %arg1[%c0, %c0_0] : memref<64x128xbf16, #tpu.memory_space<vmem>>, vector<64x128xbf16>
    %1 = arith.extf %0 : vector<64x128xbf16> to vector<64x128xf32>
    %c0_1 = arith.constant 0 : index
    %c0_2 = arith.constant 0 : index
    %2 = vector.load %arg2[%c0_1, %c0_2] : memref<8x64xbf16, #tpu.memory_space<vmem>>, vector<8x64xbf16>
    %3 = arith.extf %2 : vector<8x64xbf16> to vector<8x64xf32>
    %cst = arith.constant dense<0.000000e+00> : vector<8x128xf32>
    %4 = tpu.matmul %3, %1, %cst {dimension_numbers = #tpu.dot_dimension_numbers<[1], [0], [0], [1], [0, 0, 1, 1], [], []>} : vector<8x64xf32>, vector<64x128xf32>, vector<8x128xf32> -> vector<8x128xf32>
    %cst_3 = arith.constant 0.000000e+00 : f32
    %5 = vector.broadcast %cst_3 : f32 to vector<8x128xf32>
    %6 = arith.maximumf %4, %5 : vector<8x128xf32>
    %7 = arith.truncf %6 : vector<8x128xf32> to vector<8x128xbf16>
    %c0_4 = arith.constant 0 : index
    %c0_5 = arith.constant 0 : index
    %8 = vector.load %arg3[%c0_4, %c0_5] : memref<8x128xbf16, #tpu.memory_space<vmem>>, vector<8x128xbf16>
    tpu.vector_store %arg3[%c0_4, %c0_5], %7 {strides = array<i32>} : memref<8x128xbf16, #tpu.memory_space<vmem>>, vector<8x128xbf16>,
    return
  }
  func.func @transform_0(%arg0: i32) -> (i32, i32) {
    %c0_i32 = arith.constant 0 : i32
    %c0_i32_0 = arith.constant 0 : i32
    return %c0_i32, %arg0 : i32, i32
  }
  func.func @transform_1(%arg0: i32) -> (i32, i32) {
    %c0_i32 = arith.constant 0 : i32
    %c0_i32_0 = arith.constant 0 : i32
    %c0_i32_1 = arith.constant 0 : i32
    return %c0_i32, %c0_i32_0 : i32, i32
  }
  func.func @transform_2(%arg0: i32) -> (i32, i32) {
    %c0_i32 = arith.constant 0 : i32
    %c0_i32_0 = arith.constant 0 : i32
    return %c0_i32, %arg0 : i32, i32
  }
}

module attributes {stable_mosaic.version = 11 : i64} {
  func.func @up_gemm_stats_kernel(%arg0: i32, %arg1: memref<72x128xbf16, #tpu.memory_space<vmem>>, %arg2: memref<16x72xbf16, #tpu.memory_space<vmem>>, %arg3: memref<16x128xf32, #tpu.memory_space<vmem>>, %arg4: memref<1x16x2xf32, #tpu.memory_space<vmem>>) attributes {dimension_semantics = [#tpu.dimension_semantics<parallel>], iteration_bounds = array<i64: 1>, scalar_prefetch = 0 : i64, scratch_operands = 0 : i64, tpu.core_type = #tpu.core_type<tc>, window_params = [{transform_indices = @transform_0, window_bounds = array<i64: 72, 128>}, {pipeline_mode = #tpu.pipeline_mode<synchronous>, transform_indices = @transform_1, window_bounds = array<i64: 16, 72>}, {transform_indices = @transform_2, window_bounds = array<i64: 16, 128>}, {transform_indices = @transform_3, window_bounds = array<i64: 1, 16, 2>}]} {
    %c0 = arith.constant 0 : index
    %c0_0 = arith.constant 0 : index
    %0 = vector.load %arg1[%c0, %c0_0] : memref<72x128xbf16, #tpu.memory_space<vmem>>, vector<72x128xbf16>
    %1 = arith.extf %0 : vector<72x128xbf16> to vector<72x128xf32>
    %c0_1 = arith.constant 0 : index
    %c0_2 = arith.constant 0 : index
    %2 = vector.load %arg2[%c0_1, %c0_2] : memref<16x72xbf16, #tpu.memory_space<vmem>>, vector<16x72xbf16>
    %3 = arith.extf %2 : vector<16x72xbf16> to vector<16x72xf32>
    %cst = arith.constant dense<0.000000e+00> : vector<16x128xf32>
    %4 = tpu.matmul %3, %1, %cst {dimension_numbers = #tpu.dot_dimension_numbers<[1], [0], [0], [1], [0, 0, 1, 1], [], []>} : vector<16x72xf32>, vector<72x128xf32>, vector<16x128xf32> -> vector<16x128xf32>
    %c0_3 = arith.constant 0 : index
    %c0_4 = arith.constant 0 : index
    %5 = vector.load %arg3[%c0_3, %c0_4] : memref<16x128xf32, #tpu.memory_space<vmem>>, vector<16x128xf32>
    tpu.vector_store %arg3[%c0_3, %c0_4], %4 {strides = array<i32>} : memref<16x128xf32, #tpu.memory_space<vmem>>, vector<16x128xf32>,
    %cst_5 = arith.constant dense<0.000000e+00> : vector<16xf32>
    %6 = vector.multi_reduction <add>, %4, %cst_5 [1] : vector<16x128xf32> to vector<16xf32>
    %7 = vector.shape_cast %6 : vector<16xf32> to vector<16x1xf32>
    %8 = arith.mulf %4, %4 : vector<16x128xf32>
    %cst_6 = arith.constant dense<0.000000e+00> : vector<16xf32>
    %9 = vector.multi_reduction <add>, %8, %cst_6 [1] : vector<16x128xf32> to vector<16xf32>
    %10 = vector.shape_cast %9 : vector<16xf32> to vector<16x1xf32>
    %11 = tpu.concatenate %7, %10 in 1 : vector<16x1xf32>, vector<16x1xf32> -> vector<16x2xf32>
    %c0_7 = arith.constant 0 : index
    %c0_8 = arith.constant 0 : index
    %c0_9 = arith.constant 0 : index
    %12 = vector.load %arg4[%c0_7, %c0_8, %c0_9] : memref<1x16x2xf32, #tpu.memory_space<vmem>>, vector<1x16x2xf32>
    %13 = vector.shape_cast %12 : vector<1x16x2xf32> to vector<16x2xf32>
    %14 = vector.shape_cast %11 : vector<16x2xf32> to vector<1x16x2xf32>
    tpu.vector_store %arg4[%c0_7, %c0_8, %c0_9], %14 {strides = array<i32>} : memref<1x16x2xf32, #tpu.memory_space<vmem>>, vector<1x16x2xf32>,
    return
  }
  func.func @transform_0(%arg0: i32) -> (i32, i32) {
    %c0_i32 = arith.constant 0 : i32
    %c0_i32_0 = arith.constant 0 : i32
    return %c0_i32, %arg0 : i32, i32
  }
  func.func @transform_1(%arg0: i32) -> (i32, i32) {
    %c0_i32 = arith.constant 0 : i32
    %c0_i32_0 = arith.constant 0 : i32
    %c0_i32_1 = arith.constant 0 : i32
    return %c0_i32, %c0_i32_0 : i32, i32
  }
  func.func @transform_2(%arg0: i32) -> (i32, i32) {
    %c0_i32 = arith.constant 0 : i32
    %c0_i32_0 = arith.constant 0 : i32
    return %c0_i32, %arg0 : i32, i32
  }
  func.func @transform_3(%arg0: i32) -> (i32, i32, i32) {
    %c0_i32 = arith.constant 0 : i32
    %c0_i32_0 = arith.constant 0 : i32
    %c0_i32_1 = arith.constant 0 : i32
    return %arg0, %c0_i32, %c0_i32_0 : i32, i32, i32
  }
}

</mosaic_0001>

<bundles_post_ra>
// kernel: unet_innermost_forward.2
= control target key start
LH: loop header
LB: loop body
LE: loop exit
PB: predicated region body
PF: predicated region fallthrough
CT: control target
= control target key end

     0   :  { %v160_v0 = vmov 0.0   ;;  %vm161_vm0 = vmmov 0   ;;  %vm29_vm1 = vcmask 523264   ;;  %s195_s0 = inlined_call_operand.vmem [shape: bf16[64,128], index: 0, kind: input, shape index: {}]   ;;  %s196_s1 = inlined_call_operand.vmem [shape: bf16[8,64], index: 1, kind: input, shape index: {}]   ;;  %s197_s2 = inlined_call_operand.vmem [shape: bf16[8,128], index: 2, kind: output, shape index: {}]  }
   0x1   :  { %139 = vmatprep.subr.mxu0 %v160_v0  ;;  %v129_v1 = vld [vmem:[%s195_s0 + $0x18] sm:$0xff]   ;;  %v128_v2 = vld [vmem:[%s195_s0 + $0x10] sm:$0xff]   ;;  %155 = vmatprep.mubr.msk.f32.mxu0 %vm161_vm0, %v160_v0  ;;  %v127_v6 = vld [vmem:[%s195_s0 + $0x8] sm:$0xff]  }
   0x2   :  { %v125_v3 = vunpack.c.l.bf16 %v129_v1  ;;  %v126_v4 = vunpack.c.h.bf16 %v129_v1  ;;  %v122_v5 = vunpack.c.h.bf16 %v128_v2  ;;  %v121_v7 = vunpack.c.l.bf16 %v128_v2  ;;  %v112_v9 = vld [vmem:[%s195_s0] sm:$0xff]  }
   0x3   :  { %v118_v8 = vunpack.c.h.bf16 %v127_v6  ;;  %v117_v10 = vunpack.c.l.bf16 %v127_v6  ;;  %v114_v11 = vunpack.c.h.bf16 %v112_v9  ;;  %v27_v12 = vld [vmem:[%s196_s1] sm:$0xf]  ;;  %v113_v13 = vunpack.c.l.bf16 %v112_v9 }
   0x4   :  { %140 = vmatpush3.msra.mxu0 %v126_v4  ;;  %v28_v14 = vunpack.c.l.bf16 %v27_v12 }
   0x5   :  { %141 = vmatprep.subr.mxu0 %v160_v0 }
   0x6   :  { %142 = vmatpush3.msra.mxu0 %v125_v3 }
   0x7   :  { %143 = vmatprep.subr.mxu0 %v160_v0 }
   0x8   :  { %144 = vmatpush3.msra.mxu0 %v122_v5 }
   0x9   :  { %145 = vmatprep.subr.mxu0 %v160_v0 }
   0xa   :  { %146 = vmatpush3.msra.mxu0 %v121_v7 }
   0xb   :  { %147 = vmatprep.subr.mxu0 %v160_v0 }
   0xc   :  { %148 = vmatpush3.msra.mxu0 %v118_v8 }
   0xd   :  { %149 = vmatprep.subr.mxu0 %v160_v0 }
   0xe   :  { %150 = vmatpush3.msra.mxu0 %v117_v10 }
   0xf   :  { %151 = vmatprep.subr.mxu0 %v160_v0 }
  0x10   :  { %152 = vmatpush3.msra.mxu0 %v114_v11 }
  0x11   :  { %153 = vmatprep.subr.mxu0 %v160_v0 }
  0x12   :  { %154 = vmatpush3.msra.mxu0 %v113_v13 }
  0x13   :  { %156 = vmatmul.mubr.msk.f32.vlgmr.msra.gmra.mxu0 %vm29_vm1, %v28_v14 }
  0xd3   :  { %v99_v15 = vpop.f32.mrf.mxu0 }
  0xd4   :  { %v103_v16 = vmax.f32 %v99_v15, 0.0 }
  0xd5   :  { %v157_v17 = vpop.f32.mrf.mxu0 }
  0xd6   :  { %v104_v18 = vpack.c.bf16 %v103_v16, %v103_v16 }
  0xd8   :  { %105 = vst [vmem:[%s197_s2] sm:$0xf] %v104_v18 }

// kernel: squeeze.34
= control target key start
LH: loop header
LB: loop body
LE: loop exit
PB: predicated region body
PF: predicated region fallthrough
CT: control target
= control target key end

     0   :  { %s40_s8 = smov 116   ;;  %vm8_vm0 = vcmask 31744   ;;  %s41_s9 = smov 120   ;;  %s58_s0 = inlined_call_operand.vmem [shape: f32[16], index: 0, kind: input, shape index: {}]   ;;  %s59_s1 = inlined_call_operand.vmem [shape: f32[4,4], index: 1, kind: output, shape index: {}]  }
   0x1   :  { %v5_v0 = vld [vmem:[%s58_s0] sm:$0x1]  ;;  %s39_s0 = smov 124  }
   0x2   :  { %6 = vst [vmem:[#allocation1] sm:$0x1] %v5_v0 }
   0x9   :  { %v10_v1 = vld [vmem:[#allocation1] sm:$0x1]  }
   0xa   :  { %v22_v2 = vld [vmem:[#allocation1] sm:$0x1]   ;;  %11 = vrot.lane.b32.xlu0 %v10_v1, %s39_s0 }
   0xb   :  { %23 = vrot.lane.b32.xlu1 %v22_v2, %s40_s8  ;;  %v7_v3 = vld [vmem:[#allocation1] sm:$0x1]  }
   0xc   :  { %v16_v4 = vld [vmem:[#allocation1] sm:$0x1]   ;;  %9 = vst.msk [vmem:[#allocation0] sm:$0x1] %vm8_vm0, %v7_v3  }
   0xe   :  { %17 = vrot.lane.b32.xlu0 %v16_v4, %s41_s9 }
  0x7c   :  { %v12_v5 = vpop.permute.xlu0 %11  }
  0x7d   :  { %v24_v6 = vpop.permute.xlu1 %23   ;;  %15 = vst.msk [vmem:[#allocation0 + $0x1] sm:$0x1] %vm8_vm0, %v12_v5  }
  0x7e   :  { %27 = vst.msk [vmem:[#allocation0 + $0x3] sm:$0x1] %vm8_vm0, %v24_v6  }
  0x80   :  { %v18_v7 = vpop.permute.xlu0 %17  }
  0x81   :  { %21 = vst.msk [vmem:[#allocation0 + $0x2] sm:$0x1] %vm8_vm0, %v18_v7  }
  0x88   :  { %v32_v8 = vld [vmem:[#allocation0] sm:$0xf] }
  0x89   :  { %35 = vst [vmem:[%s59_s1] sm:$0xf] %v32_v8 }

// kernel: tile.18
= control target key start
LH: loop header
LB: loop body
LE: loop exit
PB: predicated region body
PF: predicated region fallthrough
CT: control target
= control target key end

     0   :  { %s22_s0 = inlined_call_operand.vmem [shape: f32[4], index: 0, kind: input, shape index: {}]   ;;  %s23_s1 = inlined_call_operand.vmem [shape: f32[4,4], index: 1, kind: output, shape index: {}]  }
   0x1   :  { %v4_v0 = vld [vmem:[%s22_s0] ss:$0 sm:$0xff] }
   0x2   :  { %5 = vst [vmem:[%s23_s1] sm:$0xf] %v4_v0 }

// kernel: unet_innermost_forward.3
= control target key start
LH: loop header
LB: loop body
LE: loop exit
PB: predicated region body
PF: predicated region fallthrough
CT: control target
= control target key end

     0   :  { %vm35_vm0 = vcmask 588800   ;;  %vm129_vm1 = vcmask 7168   ;;  %vm132_vm2 = vcmask 15360   ;;  %s252_s0 = inlined_call_operand.vmem [shape: bf16[72,128], index: 0, kind: input, shape index: {}]   ;;  %s253_s1 = inlined_call_operand.vmem [shape: bf16[16,72], index: 1, kind: input, shape index: {}]   ;;  %s254_s2 = inlined_call_operand.vmem [shape: f32[16,128], index: 2, kind: output, shape index: {0}]   ;;  %s255_s3 = inlined_call_operand.vmem [shape: f32[1,16,2], index: 3, kind: output, shape index: {1}]  }
   0x1   :  { %v21_v0 = vld [vmem:[%s252_s0 + $0x20] sm:$0xf]  ;;  %v167_v1 = vld [vmem:[%s252_s0 + $0x18] sm:$0xff]   ;;  %v166_v5 = vld [vmem:[%s252_s0 + $0x10] sm:$0xff]  }
   0x2   :  { %v30_v2 = vunpack.c.l.bf16 %v21_v0  ;;  %v160_v3 = vunpack.c.h.bf16 %v167_v1  ;;  %v162_v4 = vld [vmem:[%s253_s1] sm:$0xff]   ;;  %v159_v6 = vunpack.c.l.bf16 %v167_v1  ;;  %v156_v8 = vunpack.c.h.bf16 %v166_v5  ;;  %v165_v9 = vld [vmem:[%s252_s0 + $0x8] sm:$0xff]  }
   0x3   :  { %v163_v7 = vunpack.c.l.bf16 %v162_v4  ;;  %v155_v10 = vunpack.c.l.bf16 %v166_v5  ;;  %v152_v11 = vunpack.c.h.bf16 %v165_v9  ;;  %v146_v12 = vld [vmem:[%s252_s0] sm:$0xff]   ;;  %v151_v13 = vunpack.c.l.bf16 %v165_v9 }
   0x4   :  { %179 = vmatprep.subr.mxu0 %v30_v2  ;;  %v148_v14 = vunpack.c.h.bf16 %v146_v12  ;;  %v147_v15 = vunpack.c.l.bf16 %v146_v12  ;;  %v164_v16 = vunpack.c.h.bf16 %v162_v4 }
   0x5   :  { %180 = vmatpush3.msra.mxu0 %v30_v2  ;;  %197 = vmatprep.mubr.msk.f32.mxu0 %vm35_vm0, %v163_v7 }
   0x6   :  { %181 = vmatprep.subr.mxu0 %v160_v3 }
   0x7   :  { %182 = vmatpush3.msra.mxu0 %v160_v3 }
   0x8   :  { %183 = vmatprep.subr.mxu0 %v159_v6 }
   0x9   :  { %184 = vmatpush3.msra.mxu0 %v159_v6 }
   0xa   :  { %185 = vmatprep.subr.mxu0 %v156_v8 }
   0xb   :  { %186 = vmatpush3.msra.mxu0 %v156_v8 }
   0xc   :  { %187 = vmatprep.subr.mxu0 %v155_v10 }
   0xd   :  { %188 = vmatpush3.msra.mxu0 %v155_v10 }
   0xe   :  { %189 = vmatprep.subr.mxu0 %v152_v11 }
   0xf   :  { %190 = vmatpush3.msra.mxu0 %v152_v11 }
  0x10   :  { %191 = vmatprep.subr.mxu0 %v151_v13 }
  0x11   :  { %192 = vmatpush3.msra.mxu0 %v151_v13 }
  0x12   :  { %193 = vmatprep.subr.mxu0 %v148_v14 }
  0x13   :  { %194 = vmatpush3.msra.mxu0 %v148_v14 }
  0x14   :  { %195 = vmatprep.subr.mxu0 %v147_v15 }
  0x15   :  { %196 = vmatpush3.msra.mxu0 %v147_v15 }
  0x16   :  { %198 = vmatmul.mubr.msk.f32.vlgmr.msra.gmra.mxu0 %vm35_vm0, %v164_v16 }
  0xd6   :  { %v199_v17 = vpop.f32.mrf.mxu0 }
  0xd7   :  { %118 = vst [vmem:[%s254_s2 + $0x8] sm:$0xff] %v199_v17  ;;  %v124_v20 = vmul.f32 %v199_v17, %v199_v17 }
  0xd8   :  { %v108_v18 = vpop.f32.mrf.mxu0 }
  0xd9   :  { %117 = vst [vmem:[%s254_s2] sm:$0xff] %v108_v18  ;;  %119 = vadd.xlane.f32.xlu0 %v108_v18  ;;  %v123_v19 = vmul.f32 %v108_v18, %v108_v18 }
  0xdb   :  { %125 = vadd.xlane.f32.xlu1 %v123_v19 }
  0xdd   :  { %121 = vadd.xlane.f32.xlu0 %v199_v17 }
  0xdf   :  { %127 = vadd.xlane.f32.xlu1 %v124_v20 }
 0x162   :  { %v120_v21 = vpop.xlane.xlu0 %119 }
 0x164   :  { %v126_v22 = vpop.xlane.xlu1 %125 }
 0x165   :  { %v130_v23 = vsel %vm129_vm1, %v120_v21, %v126_v22 }
 0x166   :  { %133 = vst.msk [vmem:[%s255_s3] sm:$0xff] %vm132_vm2, %v130_v23  ;;  %v122_v24 = vpop.xlane.xlu0 %121 }
 0x168   :  { %v128_v25 = vpop.xlane.xlu1 %127 }
 0x169   :  { %v131_v26 = vsel %vm129_vm1, %v122_v24, %v128_v25 }
 0x16a   :  { %134 = vst.msk [vmem:[%s255_s3 + $0x8] sm:$0xff] %vm132_vm2, %v131_v26 }

</bundles_post_ra>
